<compile_context>
chip_gen: v6e
topology: v6e:2x2x1
jax: 0.10.0
libtpu: 0.0.40
codegen_flags: <defaults>
</compile_context>

<pallas_src>
import functools

import jax
import jax.numpy as jnp
from jax.experimental import pallas as pl
from jax.experimental.pallas import tpu as pltpu

_MIB = 1024 * 1024


# ---------------------------------------------------------------------------
# VMEM re-budgeting per TPU generation.
# ---------------------------------------------------------------------------
def _vmem_budget():
    """Return (vmem_limit_bytes, max_query_tile) for the local TPU generation."""
    cap = 64 * _MIB                                   # assume most constrained (v7x per-core)
    try:
        cap = int(pltpu.get_tpu_info().vmem_capacity_bytes)
    except Exception:
        pass
    if cap >= 96 * _MIB:                              # v5e / v6e: 128 MiB per core
        return 64 * _MIB, 512
    return 40 * _MIB, 256                             # v7x: 64 MiB per core


def _pick_tq(seq_q, seq_kv, dim, max_tq, budget_bytes):
    """Largest query tile whose estimated attention-kernel VMEM footprint fits."""
    if seq_q <= 256:
        return seq_q

    def est(tq):
        kv_res = 2 * 2 * dim * seq_kv * 2             # K^T + V blocks (2x buffered, bf16)
        w = 2 * dim * dim * 2                         # wq + wo (single buffered, bf16)
        x_out = 2 * tq * dim * 2 + 2 * tq * dim * 4   # x blocks (bf16) + out blocks (f32)
        scr = 2 * tq * dim * 2                        # q_sc + ctx_sc scratch
        tmp = tq * seq_kv * 10                        # f32 score temporaries + bf16 copy
        return kv_res + w + x_out + scr + tmp

    for tq in (512, 256):
        if tq <= max_tq and est(tq) <= budget_bytes:
            return tq
    return 256


# ---------------------------------------------------------------------------
# Kernel 1: per-batch K / V projection (also the decode-time K/V cache builder).
# ---------------------------------------------------------------------------
def _kv_proj_kernel(kv_dm_ref, kv_sm_ref, wkt_ref, wv_ref, bv_ref, kt_ref, v_ref):
    # kv_dm : (1, dim, tkv) bf16  channel-major activations (native NCHW slice)
    # kv_sm : (1, tkv, dim) bf16  sequence-major activations
    # K^T = Wk^T @ X^T : K is stored transposed so the attention kernel's score
    # matmul needs no per-head / per-q-tile transposes.
    kt_ref[0] = jnp.dot(wkt_ref[...], kv_dm_ref[0],
                        preferred_element_type=jnp.float32).astype(jnp.bfloat16)
    v_ref[0] = (jnp.dot(kv_sm_ref[0], wv_ref[...],
                        preferred_element_type=jnp.float32)
                + bv_ref[...]).astype(jnp.bfloat16)


def project_kv(kv_nchw, params):
    """Project key/value activations once.

    kv_nchw: (bs, dim, 1, seq_kv) f32.
    Returns (k_t, v): k_t (bs, dim, seq_kv) bf16 (K pre-transposed),
                      v   (bs, seq_kv, dim) bf16.
    The result can be reused across decode steps as a cross-attention cache.
    """
    bs, dim, one, seq_kv = kv_nchw.shape
    assert one == 1
    kv_dm = kv_nchw[:, :, 0, :].astype(jnp.bfloat16)   # already channel-major; no transpose
    kv_sm = jnp.transpose(kv_dm, (0, 2, 1))            # (bs, seq_kv, dim)
    wkt = params["wk"].T.astype(jnp.bfloat16)          # Wk^T for the transposed projection
    wv = params["wv"].astype(jnp.bfloat16)
    bv = params["bv"].astype(jnp.float32)

    tkv = seq_kv if seq_kv <= 512 else 512
    n_kt = pl.cdiv(seq_kv, tkv)
    const = lambda b, j: (0, 0)

    return pl.pallas_call(
        _kv_proj_kernel,
        out_shape=(jax.ShapeDtypeStruct((bs, dim, seq_kv), jnp.bfloat16),
                   jax.ShapeDtypeStruct((bs, seq_kv, dim), jnp.bfloat16)),
        grid=(bs, n_kt),
        in_specs=[
            pl.BlockSpec((1, dim, tkv), lambda b, j: (b, 0, j)),
            pl.BlockSpec((1, tkv, dim), lambda b, j: (b, j, 0)),
            # Constant-index weights/bias: single-buffered (no dead VMEM).
            pl.BlockSpec((dim, dim), const, pipeline_mode=pl.Buffered(1)),
            pl.BlockSpec((dim, dim), const, pipeline_mode=pl.Buffered(1)),
            pl.BlockSpec((1, dim), const, pipeline_mode=pl.Buffered(1)),
        ],
        out_specs=(pl.BlockSpec((1, dim, tkv), lambda b, j: (b, 0, j)),
                   pl.BlockSpec((1, tkv, dim), lambda b, j: (b, j, 0))),
        compiler_params=pltpu.CompilerParams(
            dimension_semantics=("parallel", "parallel"),
            vmem_limit_bytes=32 * _MIB,
        ),
    )(kv_dm, kv_sm, wkt, wv, bv)


# ---------------------------------------------------------------------------
# Kernel 2: fused Q-projection + per-head attention + output projection.
# ---------------------------------------------------------------------------
def _attn_kernel(x_ref, kt_ref, v_ref, wq_ref, bq_ref, wo_ref, bo_ref, o_ref,
                 q_sc, ctx_sc, *, n_head: int):
    # Blocks:
    #   x_ref  : (1, tq, dim)      bf16   query-tile activations
    #   kt_ref : (1, dim, seq_kv)  bf16   K^T, resident per batch
    #   v_ref  : (1, seq_kv, dim)  bf16   V, resident per batch
    #   wq/wo  : (dim, dim) bf16 ; bq/bo : (1, dim) f32  (wq/bq pre-scaled by dph**-0.5)
    #   o_ref  : (1, tq, dim)      f32
    # Scratch:
    #   q_sc   : (tq, dim) bf16   projected queries for this tile
    #   ctx_sc : (tq, dim) bf16   concatenated per-head contexts
    dim = q_sc.shape[1]
    dph = dim // n_head

    # Query projection (softmax scale already folded into wq/bq).
    x = x_ref[0]                                                   # (tq, dim) bf16
    q = jnp.dot(x, wq_ref[...], preferred_element_type=jnp.float32) + bq_ref[...]
    q_sc[...] = q.astype(jnp.bfloat16)

    for h in range(n_head):                                        # static unroll over heads
        lo = h * dph
        qh = q_sc[:, lo:lo + dph]                                  # (tq, dph)     bf16
        kth = kt_ref[0, lo:lo + dph, :]                            # (dph, seq_kv) bf16 (sublane slice)

        # scores = q_h @ K_h^T  -- K already stored transposed, plain matmul.
        s = jnp.dot(qh, kth, preferred_element_type=jnp.float32)   # (tq, seq_kv) f32
        s = s - jnp.max(s, axis=-1, keepdims=True)
        p = jnp.exp(s)                                             # values in (0, 1]
        denom = jnp.sum(p, axis=-1, keepdims=True)                 # (tq, 1) f32

        vh = v_ref[0, :, lo:lo + dph]                              # (seq_kv, dph) bf16
        ctx = jnp.dot(p.astype(jnp.bfloat16), vh,
                      preferred_element_type=jnp.float32)          # (tq, dph) f32
        # Deferred softmax normalization: scale the small (tq, dph) context
        # instead of the (tq, seq_kv) probability matrix; reciprocal on the EUP.
        ctx = ctx * pl.reciprocal(denom, approx=True)
        ctx_sc[:, lo:lo + dph] = ctx.astype(jnp.bfloat16)

    # Single full-width output projection (contraction K = dim -> full MXU fill),
    # instead of n_head K=dph matmuls + passes over an f32 accumulator.
    out = jnp.dot(ctx_sc[...], wo_ref[...], preferred_element_type=jnp.float32)
    o_ref[0] = (out + bo_ref[...]).astype(o_ref.dtype)


def mha_ane_forward(x_nchw, params, n_head, xa_nchw=None, kv_proj=None):
    """x_nchw: (bs, dim, 1, seq_q) f32; optional xa_nchw: (bs, dim, 1, seq_kv) f32.
    Optional kv_proj = project_kv(...) result to reuse a K/V cache (decode).
    Returns (bs, dim, 1, seq_q) f32."""
    bs, dim, one, seq_q = x_nchw.shape
    assert one == 1 and dim % n_head == 0

    if kv_proj is None:
        kv_src = x_nchw if xa_nchw is None else xa_nchw
        assert kv_src.shape[0] == bs and kv_src.shape[1] == dim and kv_src.shape[2] == 1
        kv_proj = project_kv(kv_src, params)
    k_t, v = kv_proj
    assert k_t.shape[0] == bs and k_t.shape[1] == dim
    seq_kv = k_t.shape[2]
    assert v.shape == (bs, seq_kv, dim)

    # NCHW(H=1) -> (bs, seq_q, dim), cast to bf16 (transpose+cast fuse under jit).
    x = jnp.transpose(x_nchw[:, :, 0, :], (0, 2, 1)).astype(jnp.bfloat16)

    dph = dim // n_head
    scale = float(dph) ** (-0.5)
    wq = (params["wq"] * scale).astype(jnp.bfloat16)   # softmax scale folded in
    bq = (params["bq"] * scale).astype(jnp.float32)
    wo = params["wo"].astype(jnp.bfloat16)
    bo = params["bo"].astype(jnp.float32)

    vmem_limit, max_tq = _vmem_budget()
    tq = _pick_tq(seq_q, seq_kv, dim, max_tq, vmem_limit - 4 * _MIB)
    n_qt = pl.cdiv(seq_q, tq)

    qmap = lambda b, qi: (b, qi, 0)
    kvmap = lambda b, qi: (b, 0, 0)          # resident across query tiles of a batch
    const = lambda b, qi: (0, 0)             # weights / biases

    out = pl.pallas_call(
        functools.partial(_attn_kernel, n_head=n_head),
        out_shape=jax.ShapeDtypeStruct((bs, seq_q, dim), jnp.float32),
        grid=(bs, n_qt),
        in_specs=[
            pl.BlockSpec((1, tq, dim), qmap),                                   # x
            pl.BlockSpec((1, dim, seq_kv), kvmap),                              # K^T
            pl.BlockSpec((1, seq_kv, dim), kvmap),                              # V
            pl.BlockSpec((dim, dim), const, pipeline_mode=pl.Buffered(1)),      # wq
            pl.BlockSpec((1, dim), const, pipeline_mode=pl.Buffered(1)),        # bq
            pl.BlockSpec((dim, dim), const, pipeline_mode=pl.Buffered(1)),      # wo
            pl.BlockSpec((1, dim), const, pipeline_mode=pl.Buffered(1)),        # bo
        ],
        out_specs=pl.BlockSpec((1, tq, dim), qmap),
        scratch_shapes=[
            pltpu.VMEM((tq, dim), jnp.bfloat16),   # projected Q for this tile
            pltpu.VMEM((tq, dim), jnp.bfloat16),   # concatenated per-head context
        ],
        compiler_params=pltpu.CompilerParams(
            # No cross-iteration state: both grid axes are independent, so the
            # q-tile axis is "parallel" too (uses v7x's second TensorCore at bs=1).
            dimension_semantics=("parallel", "parallel"),
            vmem_limit_bytes=vmem_limit,
        ),
    )(x, k_t, v, wq, bq, wo, bo)

    # (bs, seq_q, dim) -> (bs, dim, 1, seq_q)
    return jnp.transpose(out, (0, 2, 1))[:, :, None, :]


# ---------------------------------------------------------------------------
# Pure-JAX reference & synthetic params.
# ---------------------------------------------------------------------------
def _reference_forward(x_nchw, params, n_head, xa_nchw=None):
    """Pure-JAX f32 mirror of the PyTorch forward (mask=None), for verification."""
    bs, dim, _, seq_q = x_nchw.shape
    dph = dim // n_head
    x = jnp.transpose(x_nchw[:, :, 0, :], (0, 2, 1))             # (bs, seq_q, dim)
    kv = x if xa_nchw is None else jnp.transpose(xa_nchw[:, :, 0, :], (0, 2, 1))
    seq_kv = kv.shape[1]
    q = x @ params["wq"] + params["bq"]
    k = kv @ params["wk"]
    v = kv @ params["wv"] + params["bv"]
    qh = q.reshape(bs, seq_q, n_head, dph)
    kh = k.reshape(bs, seq_kv, n_head, dph)
    vh = v.reshape(bs, seq_kv, n_head, dph)
    s = jnp.einsum("bqhc,bkhc->bhqk", qh, kh) * (float(dph) ** -0.5)
    p = jax.nn.softmax(s, axis=-1)
    o = jnp.einsum("bhqk,bkhc->bqhc", p, vh).reshape(bs, seq_q, dim)
    out = o @ params["wo"] + params["bo"]
    return jnp.transpose(out, (0, 2, 1))[:, :, None, :]


def init_params(key, dim):
    """Deterministic synthetic weights.  Conv2d 1x1 weight (out,in,1,1) is stored
    pre-transposed as (in, out) so projections are `x @ W + b`."""
    ks = jax.random.split(key, 7)
    scale = 1.0 / (dim ** 0.5)
    u = lambda k, shape: jax.random.uniform(k, shape, jnp.float32, -scale, scale)
    return {
        "wq": u(ks[0], (dim, dim)), "bq": u(ks[1], (1, dim)),
        "wk": u(ks[2], (dim, dim)),                      # key has no bias
        "wv": u(ks[3], (dim, dim)), "bv": u(ks[4], (1, dim)),
        "wo": u(ks[5], (dim, dim)), "bo": u(ks[6], (1, dim)),
    }


if __name__ == "__main__":
    bs, dim, seq, n_head = 2, 32, 16, 4
    seq_xa = 24   # cross-attention key/value length (differs from query length)

    key = jax.random.PRNGKey(0)
    k_x, k_xa, k_p = jax.random.split(key, 3)
    x = jax.random.normal(k_x, (bs, dim, 1, seq), jnp.float32)    # NCHW, H == 1
    xa = jax.random.normal(k_xa, (bs, dim, 1, seq_xa), jnp.float32)
    params = init_params(k_p, dim)

    fwd = jax.jit(mha_ane_forward, static_argnames=("n_head",))

    # Self-attention.
    out = jax.block_until_ready(fwd(x, params, n_head=n_head))
    ref = _reference_forward(x, params, n_head)
    assert out.shape == (bs, dim, 1, seq)
    err = float(jnp.max(jnp.abs(out - ref)))
    assert err < 7.5e-2, f"self-attention mismatch vs JAX reference (max abs err {err})"

    # Cross-attention with a different key/value length.
    out_x = jax.block_until_ready(fwd(x, params, n_head=n_head, xa_nchw=xa))
    ref_x = _reference_forward(x, params, n_head, xa_nchw=xa)
    assert out_x.shape == (bs, dim, 1, seq)
    err_x = float(jnp.max(jnp.abs(out_x - ref_x)))
    assert err_x < 7.5e-2, f"cross-attention mismatch vs JAX reference (max abs err {err_x})"

    # Pre-projected K/V cache path (decode-style reuse of the projection kernel).
    cache = jax.block_until_ready(project_kv(xa, params))
    out_c = jax.block_until_ready(fwd(x, params, n_head=n_head, kv_proj=cache))
    err_c = float(jnp.max(jnp.abs(out_c - ref_x)))
    assert err_c < 7.5e-2, f"cached-KV cross-attention mismatch (max abs err {err_c})"

    print("KERNEL_OK")
</pallas_src>

<mosaic_0001>
module attributes {stable_mosaic.version = 11 : i64} {
  func.func @_kv_proj_kernel(%arg0: i32, %arg1: i32, %arg2: memref<1x32x16xbf16, #tpu.memory_space<vmem>>, %arg3: memref<1x16x32xbf16, #tpu.memory_space<vmem>>, %arg4: memref<32x32xbf16, #tpu.memory_space<vmem>>, %arg5: memref<32x32xbf16, #tpu.memory_space<vmem>>, %arg6: memref<1x32xf32, #tpu.memory_space<vmem>>, %arg7: memref<1x32x16xbf16, #tpu.memory_space<vmem>>, %arg8: memref<1x16x32xbf16, #tpu.memory_space<vmem>>) attributes {dimension_semantics = [#tpu.dimension_semantics<parallel>, #tpu.dimension_semantics<parallel>], iteration_bounds = array<i64: 2, 1>, scalar_prefetch = 0 : i64, scratch_operands = 0 : i64, tpu.core_type = #tpu.core_type<tc>, window_params = [{transform_indices = @transform_0, window_bounds = array<i64: 1, 32, 16>}, {transform_indices = @transform_1, window_bounds = array<i64: 1, 16, 32>}, {pipeline_mode = #tpu.pipeline_mode<synchronous>, transform_indices = @transform_2, window_bounds = array<i64: 32, 32>}, {pipeline_mode = #tpu.pipeline_mode<synchronous>, transform_indices = @transform_3, window_bounds = array<i64: 32, 32>}, {pipeline_mode = #tpu.pipeline_mode<synchronous>, transform_indices = @transform_4, window_bounds = array<i64: 1, 32>}, {transform_indices = @transform_5, window_bounds = array<i64: 1, 32, 16>}, {transform_indices = @transform_6, window_bounds = array<i64: 1, 16, 32>}]} {
    %c0 = arith.constant 0 : index
    %c0_0 = arith.constant 0 : index
    %0 = vector.load %arg4[%c0, %c0_0] : memref<32x32xbf16, #tpu.memory_space<vmem>>, vector<32x32xbf16>
    %c0_1 = arith.constant 0 : index
    %c0_2 = arith.constant 0 : index
    %c0_3 = arith.constant 0 : index
    %1 = vector.load %arg2[%c0_1, %c0_2, %c0_3] : memref<1x32x16xbf16, #tpu.memory_space<vmem>>, vector<1x32x16xbf16>
    %2 = vector.shape_cast %1 : vector<1x32x16xbf16> to vector<32x16xbf16>
    %cst = arith.constant dense<0.000000e+00> : vector<32x16xf32>
    %3 = tpu.matmul %0, %2, %cst {dimension_numbers = #tpu.dot_dimension_numbers<[1], [0], [0], [1], [0, 0, 1, 1], [], []>} : vector<32x32xbf16>, vector<32x16xbf16>, vector<32x16xf32> -> vector<32x16xf32>
    %4 = arith.truncf %3 : vector<32x16xf32> to vector<32x16xbf16>
    %c0_4 = arith.constant 0 : index
    %c0_5 = arith.constant 0 : index
    %c0_6 = arith.constant 0 : index
    %5 = vector.load %arg7[%c0_4, %c0_5, %c0_6] : memref<1x32x16xbf16, #tpu.memory_space<vmem>>, vector<1x32x16xbf16>
    %6 = vector.shape_cast %5 : vector<1x32x16xbf16> to vector<32x16xbf16>
    %7 = vector.shape_cast %4 : vector<32x16xbf16> to vector<1x32x16xbf16>
    tpu.vector_store %arg7[%c0_4, %c0_5, %c0_6], %7 {strides = array<i32>} : memref<1x32x16xbf16, #tpu.memory_space<vmem>>, vector<1x32x16xbf16>,
    %c0_7 = arith.constant 0 : index
    %c0_8 = arith.constant 0 : index
    %c0_9 = arith.constant 0 : index
    %8 = vector.load %arg3[%c0_7, %c0_8, %c0_9] : memref<1x16x32xbf16, #tpu.memory_space<vmem>>, vector<1x16x32xbf16>
    %9 = vector.shape_cast %8 : vector<1x16x32xbf16> to vector<16x32xbf16>
    %c0_10 = arith.constant 0 : index
    %c0_11 = arith.constant 0 : index
    %10 = vector.load %arg5[%c0_10, %c0_11] : memref<32x32xbf16, #tpu.memory_space<vmem>>, vector<32x32xbf16>
    %cst_12 = arith.constant dense<0.000000e+00> : vector<16x32xf32>
    %11 = tpu.matmul %9, %10, %cst_12 {dimension_numbers = #tpu.dot_dimension_numbers<[1], [0], [0], [1], [0, 0, 1, 1], [], []>} : vector<16x32xbf16>, vector<32x32xbf16>, vector<16x32xf32> -> vector<16x32xf32>
    %c0_13 = arith.constant 0 : index
    %c0_14 = arith.constant 0 : index
    %12 = vector.load %arg6[%c0_13, %c0_14] : memref<1x32xf32, #tpu.memory_space<vmem>>, vector<1x32xf32>
    %13 = vector.broadcast %12 : vector<1x32xf32> to vector<16x32xf32>
    %14 = arith.addf %11, %13 : vector<16x32xf32>
    %15 = arith.truncf %14 : vector<16x32xf32> to vector<16x32xbf16>
    %c0_15 = arith.constant 0 : index
    %c0_16 = arith.constant 0 : index
    %c0_17 = arith.constant 0 : index
    %16 = vector.load %arg8[%c0_15, %c0_16, %c0_17] : memref<1x16x32xbf16, #tpu.memory_space<vmem>>, vector<1x16x32xbf16>
    %17 = vector.shape_cast %16 : vector<1x16x32xbf16> to vector<16x32xbf16>
    %18 = vector.shape_cast %15 : vector<16x32xbf16> to vector<1x16x32xbf16>
    tpu.vector_store %arg8[%c0_15, %c0_16, %c0_17], %18 {strides = array<i32>} : memref<1x16x32xbf16, #tpu.memory_space<vmem>>, vector<1x16x32xbf16>,
    return
  }
  func.func @transform_0(%arg0: i32, %arg1: i32) -> (i32, i32, i32) {
    %c0_i32 = arith.constant 0 : i32
    %c0_i32_0 = arith.constant 0 : i32
    return %arg0, %c0_i32, %arg1 : i32, i32, i32
  }
  func.func @transform_1(%arg0: i32, %arg1: i32) -> (i32, i32, i32) {
    %c0_i32 = arith.constant 0 : i32
    %c0_i32_0 = arith.constant 0 : i32
    return %arg0, %arg1, %c0_i32 : i32, i32, i32
  }
  func.func @transform_2(%arg0: i32, %arg1: i32) -> (i32, i32) {
    %c0_i32 = arith.constant 0 : i32
    %c0_i32_0 = arith.constant 0 : i32
    %c0_i32_1 = arith.constant 0 : i32
    return %c0_i32, %c0_i32_0 : i32, i32
  }
  func.func @transform_3(%arg0: i32, %arg1: i32) -> (i32, i32) {
    %c0_i32 = arith.constant 0 : i32
    %c0_i32_0 = arith.constant 0 : i32
    %c0_i32_1 = arith.constant 0 : i32
    return %c0_i32, %c0_i32_0 : i32, i32
  }
  func.func @transform_4(%arg0: i32, %arg1: i32) -> (i32, i32) {
    %c0_i32 = arith.constant 0 : i32
    %c0_i32_0 = arith.constant 0 : i32
    %c0_i32_1 = arith.constant 0 : i32
    return %c0_i32, %c0_i32_0 : i32, i32
  }
  func.func @transform_5(%arg0: i32, %arg1: i32) -> (i32, i32, i32) {
    %c0_i32 = arith.constant 0 : i32
    %c0_i32_0 = arith.constant 0 : i32
    return %arg0, %c0_i32, %arg1 : i32, i32, i32
  }
  func.func @transform_6(%arg0: i32, %arg1: i32) -> (i32, i32, i32) {
    %c0_i32 = arith.constant 0 : i32
    %c0_i32_0 = arith.constant 0 : i32
    return %arg0, %arg1, %c0_i32 : i32, i32, i32
  }
}

module attributes {stable_mosaic.version = 11 : i64} {
  func.func @_attn_kernel(%arg0: i32, %arg1: i32, %arg2: memref<1x16x32xbf16, #tpu.memory_space<vmem>>, %arg3: memref<1x32x16xbf16, #tpu.memory_space<vmem>>, %arg4: memref<1x16x32xbf16, #tpu.memory_space<vmem>>, %arg5: memref<32x32xbf16, #tpu.memory_space<vmem>>, %arg6: memref<1x32xf32, #tpu.memory_space<vmem>>, %arg7: memref<32x32xbf16, #tpu.memory_space<vmem>>, %arg8: memref<1x32xf32, #tpu.memory_space<vmem>>, %arg9: memref<1x16x32xf32, #tpu.memory_space<vmem>>, %arg10: memref<16x32xbf16, #tpu.memory_space<vmem>>, %arg11: memref<16x32xbf16, #tpu.memory_space<vmem>>) attributes {dimension_semantics = [#tpu.dimension_semantics<parallel>, #tpu.dimension_semantics<parallel>], iteration_bounds = array<i64: 2, 1>, scalar_prefetch = 0 : i64, scratch_operands = 2 : i64, tpu.core_type = #tpu.core_type<tc>, window_params = [{transform_indices = @transform_0, window_bounds = array<i64: 1, 16, 32>}, {transform_indices = @transform_1, window_bounds = array<i64: 1, 32, 16>}, {transform_indices = @transform_2, window_bounds = array<i64: 1, 16, 32>}, {pipeline_mode = #tpu.pipeline_mode<synchronous>, transform_indices = @transform_3, window_bounds = array<i64: 32, 32>}, {pipeline_mode = #tpu.pipeline_mode<synchronous>, transform_indices = @transform_4, window_bounds = array<i64: 1, 32>}, {pipeline_mode = #tpu.pipeline_mode<synchronous>, transform_indices = @transform_5, window_bounds = array<i64: 32, 32>}, {pipeline_mode = #tpu.pipeline_mode<synchronous>, transform_indices = @transform_6, window_bounds = array<i64: 1, 32>}, {transform_indices = @transform_7, window_bounds = array<i64: 1, 16, 32>}]} {
    %c0 = arith.constant 0 : index
    %c0_0 = arith.constant 0 : index
    %c0_1 = arith.constant 0 : index
    %0 = vector.load %arg2[%c0, %c0_0, %c0_1] : memref<1x16x32xbf16, #tpu.memory_space<vmem>>, vector<1x16x32xbf16>
    %1 = vector.shape_cast %0 : vector<1x16x32xbf16> to vector<16x32xbf16>
    %c0_2 = arith.constant 0 : index
    %c0_3 = arith.constant 0 : index
    %2 = vector.load %arg5[%c0_2, %c0_3] : memref<32x32xbf16, #tpu.memory_space<vmem>>, vector<32x32xbf16>
    %cst = arith.constant dense<0.000000e+00> : vector<16x32xf32>
    %3 = tpu.matmul %1, %2, %cst {dimension_numbers = #tpu.dot_dimension_numbers<[1], [0], [0], [1], [0, 0, 1, 1], [], []>} : vector<16x32xbf16>, vector<32x32xbf16>, vector<16x32xf32> -> vector<16x32xf32>
    %c0_4 = arith.constant 0 : index
    %c0_5 = arith.constant 0 : index
    %4 = vector.load %arg6[%c0_4, %c0_5] : memref<1x32xf32, #tpu.memory_space<vmem>>, vector<1x32xf32>
    %5 = vector.broadcast %4 : vector<1x32xf32> to vector<16x32xf32>
    %6 = arith.addf %3, %5 : vector<16x32xf32>
    %7 = arith.truncf %6 : vector<16x32xf32> to vector<16x32xbf16>
    %c0_6 = arith.constant 0 : index
    %c0_7 = arith.constant 0 : index
    %8 = vector.load %arg10[%c0_6, %c0_7] : memref<16x32xbf16, #tpu.memory_space<vmem>>, vector<16x32xbf16>
    tpu.vector_store %arg10[%c0_6, %c0_7], %7 {strides = array<i32>} : memref<16x32xbf16, #tpu.memory_space<vmem>>, vector<16x32xbf16>,
    %c0_8 = arith.constant 0 : index
    %c0_9 = arith.constant 0 : index
    %9 = vector.load %arg10[%c0_8, %c0_9] : memref<16x32xbf16, #tpu.memory_space<vmem>>, vector<16x8xbf16>
    %c0_10 = arith.constant 0 : index
    %c0_11 = arith.constant 0 : index
    %c0_12 = arith.constant 0 : index
    %10 = vector.load %arg3[%c0_10, %c0_11, %c0_12] : memref<1x32x16xbf16, #tpu.memory_space<vmem>>, vector<1x8x16xbf16>
    %11 = vector.shape_cast %10 : vector<1x8x16xbf16> to vector<8x16xbf16>
    %cst_13 = arith.constant dense<0.000000e+00> : vector<16x16xf32>
    %12 = tpu.matmul %9, %11, %cst_13 {dimension_numbers = #tpu.dot_dimension_numbers<[1], [0], [0], [1], [0, 0, 1, 1], [], []>} : vector<16x8xbf16>, vector<8x16xbf16>, vector<16x16xf32> -> vector<16x16xf32>
    %cst_14 = arith.constant dense<0xFF800000> : vector<16xf32>
    %13 = vector.multi_reduction <maximumf>, %12, %cst_14 [1] : vector<16x16xf32> to vector<16xf32>
    %14 = vector.shape_cast %13 : vector<16xf32> to vector<16x1xf32>
    %15 = vector.broadcast %14 : vector<16x1xf32> to vector<16x16xf32>
    %16 = arith.subf %12, %15 : vector<16x16xf32>
    %17 = math.exp %16 : vector<16x16xf32>
    %cst_15 = arith.constant dense<0.000000e+00> : vector<16xf32>
    %18 = vector.multi_reduction <add>, %17, %cst_15 [1] : vector<16x16xf32> to vector<16xf32>
    %19 = vector.shape_cast %18 : vector<16xf32> to vector<16x1xf32>
    %c0_16 = arith.constant 0 : index
    %c0_17 = arith.constant 0 : index
    %c0_18 = arith.constant 0 : index
    %20 = vector.load %arg4[%c0_16, %c0_17, %c0_18] : memref<1x16x32xbf16, #tpu.memory_space<vmem>>, vector<1x16x8xbf16>
    %21 = vector.shape_cast %20 : vector<1x16x8xbf16> to vector<16x8xbf16>
    %22 = arith.truncf %17 : vector<16x16xf32> to vector<16x16xbf16>
    %cst_19 = arith.constant dense<0.000000e+00> : vector<16x8xf32>
    %23 = tpu.matmul %22, %21, %cst_19 {dimension_numbers = #tpu.dot_dimension_numbers<[1], [0], [0], [1], [0, 0, 1, 1], [], []>} : vector<16x16xbf16>, vector<16x8xbf16>, vector<16x8xf32> -> vector<16x8xf32>
    %24 = tpu.reciprocal %19 {approx = true} : vector<16x1xf32> -> vector<16x1xf32>
    %25 = vector.broadcast %24 : vector<16x1xf32> to vector<16x8xf32>
    %26 = arith.mulf %23, %25 : vector<16x8xf32>
    %27 = arith.truncf %26 : vector<16x8xf32> to vector<16x8xbf16>
    %c0_20 = arith.constant 0 : index
    %c0_21 = arith.constant 0 : index
    %28 = vector.load %arg11[%c0_20, %c0_21] : memref<16x32xbf16, #tpu.memory_space<vmem>>, vector<16x8xbf16>
    tpu.vector_store %arg11[%c0_20, %c0_21], %27 {strides = array<i32>} : memref<16x32xbf16, #tpu.memory_space<vmem>>, vector<16x8xbf16>,
    %c0_22 = arith.constant 0 : index
    %c8 = arith.constant 8 : index
    %29 = vector.load %arg10[%c0_22, %c8] : memref<16x32xbf16, #tpu.memory_space<vmem>>, vector<16x8xbf16>
    %c0_23 = arith.constant 0 : index
    %c8_24 = arith.constant 8 : index
    %c0_25 = arith.constant 0 : index
    %30 = vector.load %arg3[%c0_23, %c8_24, %c0_25] : memref<1x32x16xbf16, #tpu.memory_space<vmem>>, vector<1x8x16xbf16>
    %31 = vector.shape_cast %30 : vector<1x8x16xbf16> to vector<8x16xbf16>
    %cst_26 = arith.constant dense<0.000000e+00> : vector<16x16xf32>
    %32 = tpu.matmul %29, %31, %cst_26 {dimension_numbers = #tpu.dot_dimension_numbers<[1], [0], [0], [1], [0, 0, 1, 1], [], []>} : vector<16x8xbf16>, vector<8x16xbf16>, vector<16x16xf32> -> vector<16x16xf32>
    %cst_27 = arith.constant dense<0xFF800000> : vector<16xf32>
    %33 = vector.multi_reduction <maximumf>, %32, %cst_27 [1] : vector<16x16xf32> to vector<16xf32>
    %34 = vector.shape_cast %33 : vector<16xf32> to vector<16x1xf32>
    %35 = vector.broadcast %34 : vector<16x1xf32> to vector<16x16xf32>
    %36 = arith.subf %32, %35 : vector<16x16xf32>
    %37 = math.exp %36 : vector<16x16xf32>
    %cst_28 = arith.constant dense<0.000000e+00> : vector<16xf32>
    %38 = vector.multi_reduction <add>, %37, %cst_28 [1] : vector<16x16xf32> to vector<16xf32>
    %39 = vector.shape_cast %38 : vector<16xf32> to vector<16x1xf32>
    %c0_29 = arith.constant 0 : index
    %c0_30 = arith.constant 0 : index
    %c8_31 = arith.constant 8 : index
    %40 = vector.load %arg4[%c0_29, %c0_30, %c8_31] : memref<1x16x32xbf16, #tpu.memory_space<vmem>>, vector<1x16x8xbf16>
    %41 = vector.shape_cast %40 : vector<1x16x8xbf16> to vector<16x8xbf16>
    %42 = arith.truncf %37 : vector<16x16xf32> to vector<16x16xbf16>
    %cst_32 = arith.constant dense<0.000000e+00> : vector<16x8xf32>
    %43 = tpu.matmul %42, %41, %cst_32 {dimension_numbers = #tpu.dot_dimension_numbers<[1], [0], [0], [1], [0, 0, 1, 1], [], []>} : vector<16x16xbf16>, vector<16x8xbf16>, vector<16x8xf32> -> vector<16x8xf32>
    %44 = tpu.reciprocal %39 {approx = true} : vector<16x1xf32> -> vector<16x1xf32>
    %45 = vector.broadcast %44 : vector<16x1xf32> to vector<16x8xf32>
    %46 = arith.mulf %43, %45 : vector<16x8xf32>
    %47 = arith.truncf %46 : vector<16x8xf32> to vector<16x8xbf16>
    %c0_33 = arith.constant 0 : index
    %c8_34 = arith.constant 8 : index
    %48 = vector.load %arg11[%c0_33, %c8_34] : memref<16x32xbf16, #tpu.memory_space<vmem>>, vector<16x8xbf16>
    tpu.vector_store %arg11[%c0_33, %c8_34], %47 {strides = array<i32>} : memref<16x32xbf16, #tpu.memory_space<vmem>>, vector<16x8xbf16>,
    %c0_35 = arith.constant 0 : index
    %c16 = arith.constant 16 : index
    %49 = vector.load %arg10[%c0_35, %c16] : memref<16x32xbf16, #tpu.memory_space<vmem>>, vector<16x8xbf16>
    %c0_36 = arith.constant 0 : index
    %c16_37 = arith.constant 16 : index
    %c0_38 = arith.constant 0 : index
    %50 = vector.load %arg3[%c0_36, %c16_37, %c0_38] : memref<1x32x16xbf16, #tpu.memory_space<vmem>>, vector<1x8x16xbf16>
    %51 = vector.shape_cast %50 : vector<1x8x16xbf16> to vector<8x16xbf16>
    %cst_39 = arith.constant dense<0.000000e+00> : vector<16x16xf32>
    %52 = tpu.matmul %49, %51, %cst_39 {dimension_numbers = #tpu.dot_dimension_numbers<[1], [0], [0], [1], [0, 0, 1, 1], [], []>} : vector<16x8xbf16>, vector<8x16xbf16>, vector<16x16xf32> -> vector<16x16xf32>
    %cst_40 = arith.constant dense<0xFF800000> : vector<16xf32>
    %53 = vector.multi_reduction <maximumf>, %52, %cst_40 [1] : vector<16x16xf32> to vector<16xf32>
    %54 = vector.shape_cast %53 : vector<16xf32> to vector<16x1xf32>
    %55 = vector.broadcast %54 : vector<16x1xf32> to vector<16x16xf32>
    %56 = arith.subf %52, %55 : vector<16x16xf32>
    %57 = math.exp %56 : vector<16x16xf32>
    %cst_41 = arith.constant dense<0.000000e+00> : vector<16xf32>
    %58 = vector.multi_reduction <add>, %57, %cst_41 [1] : vector<16x16xf32> to vector<16xf32>
    %59 = vector.shape_cast %58 : vector<16xf32> to vector<16x1xf32>
    %c0_42 = arith.constant 0 : index
    %c0_43 = arith.constant 0 : index
    %c16_44 = arith.constant 16 : index
    %60 = vector.load %arg4[%c0_42, %c0_43, %c16_44] : memref<1x16x32xbf16, #tpu.memory_space<vmem>>, vector<1x16x8xbf16>
    %61 = vector.shape_cast %60 : vector<1x16x8xbf16> to vector<16x8xbf16>
    %62 = arith.truncf %57 : vector<16x16xf32> to vector<16x16xbf16>
    %cst_45 = arith.constant dense<0.000000e+00> : vector<16x8xf32>
    %63 = tpu.matmul %62, %61, %cst_45 {dimension_numbers = #tpu.dot_dimension_numbers<[1], [0], [0], [1], [0, 0, 1, 1], [], []>} : vector<16x16xbf16>, vector<16x8xbf16>, vector<16x8xf32> -> vector<16x8xf32>
    %64 = tpu.reciprocal %59 {approx = true} : vector<16x1xf32> -> vector<16x1xf32>
    %65 = vector.broadcast %64 : vector<16x1xf32> to vector<16x8xf32>
    %66 = arith.mulf %63, %65 : vector<16x8xf32>
    %67 = arith.truncf %66 : vector<16x8xf32> to vector<16x8xbf16>
    %c0_46 = arith.constant 0 : index
    %c16_47 = arith.constant 16 : index
    %68 = vector.load %arg11[%c0_46, %c16_47] : memref<16x32xbf16, #tpu.memory_space<vmem>>, vector<16x8xbf16>
    tpu.vector_store %arg11[%c0_46, %c16_47], %67 {strides = array<i32>} : memref<16x32xbf16, #tpu.memory_space<vmem>>, vector<16x8xbf16>,
    %c0_48 = arith.constant 0 : index
    %c24 = arith.constant 24 : index
    %69 = vector.load %arg10[%c0_48, %c24] : memref<16x32xbf16, #tpu.memory_space<vmem>>, vector<16x8xbf16>
    %c0_49 = arith.constant 0 : index
    %c24_50 = arith.constant 24 : index
    %c0_51 = arith.constant 0 : index
    %70 = vector.load %arg3[%c0_49, %c24_50, %c0_51] : memref<1x32x16xbf16, #tpu.memory_space<vmem>>, vector<1x8x16xbf16>
    %71 = vector.shape_cast %70 : vector<1x8x16xbf16> to vector<8x16xbf16>
    %cst_52 = arith.constant dense<0.000000e+00> : vector<16x16xf32>
    %72 = tpu.matmul %69, %71, %cst_52 {dimension_numbers = #tpu.dot_dimension_numbers<[1], [0], [0], [1], [0, 0, 1, 1], [], []>} : vector<16x8xbf16>, vector<8x16xbf16>, vector<16x16xf32> -> vector<16x16xf32>
    %cst_53 = arith.constant dense<0xFF800000> : vector<16xf32>
    %73 = vector.multi_reduction <maximumf>, %72, %cst_53 [1] : vector<16x16xf32> to vector<16xf32>
    %74 = vector.shape_cast %73 : vector<16xf32> to vector<16x1xf32>
    %75 = vector.broadcast %74 : vector<16x1xf32> to vector<16x16xf32>
    %76 = arith.subf %72, %75 : vector<16x16xf32>
    %77 = math.exp %76 : vector<16x16xf32>
    %cst_54 = arith.constant dense<0.000000e+00> : vector<16xf32>
    %78 = vector.multi_reduction <add>, %77, %cst_54 [1] : vector<16x16xf32> to vector<16xf32>
    %79 = vector.shape_cast %78 : vector<16xf32> to vector<16x1xf32>
    %c0_55 = arith.constant 0 : index
    %c0_56 = arith.constant 0 : index
    %c24_57 = arith.constant 24 : index
    %80 = vector.load %arg4[%c0_55, %c0_56, %c24_57] : memref<1x16x32xbf16, #tpu.memory_space<vmem>>, vector<1x16x8xbf16>
    %81 = vector.shape_cast %80 : vector<1x16x8xbf16> to vector<16x8xbf16>
    %82 = arith.truncf %77 : vector<16x16xf32> to vector<16x16xbf16>
    %cst_58 = arith.constant dense<0.000000e+00> : vector<16x8xf32>
    %83 = tpu.matmul %82, %81, %cst_58 {dimension_numbers = #tpu.dot_dimension_numbers<[1], [0], [0], [1], [0, 0, 1, 1], [], []>} : vector<16x16xbf16>, vector<16x8xbf16>, vector<16x8xf32> -> vector<16x8xf32>
    %84 = tpu.reciprocal %79 {approx = true} : vector<16x1xf32> -> vector<16x1xf32>
    %85 = vector.broadcast %84 : vector<16x1xf32> to vector<16x8xf32>
    %86 = arith.mulf %83, %85 : vector<16x8xf32>
    %87 = arith.truncf %86 : vector<16x8xf32> to vector<16x8xbf16>
    %c0_59 = arith.constant 0 : index
    %c24_60 = arith.constant 24 : index
    %88 = vector.load %arg11[%c0_59, %c24_60] : memref<16x32xbf16, #tpu.memory_space<vmem>>, vector<16x8xbf16>
    tpu.vector_store %arg11[%c0_59, %c24_60], %87 {strides = array<i32>} : memref<16x32xbf16, #tpu.memory_space<vmem>>, vector<16x8xbf16>,
    %c0_61 = arith.constant 0 : index
    %c0_62 = arith.constant 0 : index
    %89 = vector.load %arg11[%c0_61, %c0_62] : memref<16x32xbf16, #tpu.memory_space<vmem>>, vector<16x32xbf16>
    %c0_63 = arith.constant 0 : index
    %c0_64 = arith.constant 0 : index
    %90 = vector.load %arg7[%c0_63, %c0_64] : memref<32x32xbf16, #tpu.memory_space<vmem>>, vector<32x32xbf16>
    %cst_65 = arith.constant dense<0.000000e+00> : vector<16x32xf32>
    %91 = tpu.matmul %89, %90, %cst_65 {dimension_numbers = #tpu.dot_dimension_numbers<[1], [0], [0], [1], [0, 0, 1, 1], [], []>} : vector<16x32xbf16>, vector<32x32xbf16>, vector<16x32xf32> -> vector<16x32xf32>
    %c0_66 = arith.constant 0 : index
    %c0_67 = arith.constant 0 : index
    %92 = vector.load %arg8[%c0_66, %c0_67] : memref<1x32xf32, #tpu.memory_space<vmem>>, vector<1x32xf32>
    %93 = vector.broadcast %92 : vector<1x32xf32> to vector<16x32xf32>
    %94 = arith.addf %91, %93 : vector<16x32xf32>
    %c0_68 = arith.constant 0 : index
    %c0_69 = arith.constant 0 : index
    %c0_70 = arith.constant 0 : index
    %95 = vector.load %arg9[%c0_68, %c0_69, %c0_70] : memref<1x16x32xf32, #tpu.memory_space<vmem>>, vector<1x16x32xf32>
    %96 = vector.shape_cast %95 : vector<1x16x32xf32> to vector<16x32xf32>
    %97 = vector.shape_cast %94 : vector<16x32xf32> to vector<1x16x32xf32>
    tpu.vector_store %arg9[%c0_68, %c0_69, %c0_70], %97 {strides = array<i32>} : memref<1x16x32xf32, #tpu.memory_space<vmem>>, vector<1x16x32xf32>,
    return
  }
  func.func @transform_0(%arg0: i32, %arg1: i32) -> (i32, i32, i32) {
    %c0_i32 = arith.constant 0 : i32
    %c0_i32_0 = arith.constant 0 : i32
    return %arg0, %arg1, %c0_i32 : i32, i32, i32
  }
  func.func @transform_1(%arg0: i32, %arg1: i32) -> (i32, i32, i32) {
    %c0_i32 = arith.constant 0 : i32
    %c0_i32_0 = arith.constant 0 : i32
    %c0_i32_1 = arith.constant 0 : i32
    return %arg0, %c0_i32, %c0_i32_0 : i32, i32, i32
  }
  func.func @transform_2(%arg0: i32, %arg1: i32) -> (i32, i32, i32) {
    %c0_i32 = arith.constant 0 : i32
    %c0_i32_0 = arith.constant 0 : i32
    %c0_i32_1 = arith.constant 0 : i32
    return %arg0, %c0_i32, %c0_i32_0 : i32, i32, i32
  }
  func.func @transform_3(%arg0: i32, %arg1: i32) -> (i32, i32) {
    %c0_i32 = arith.constant 0 : i32
    %c0_i32_0 = arith.constant 0 : i32
    %c0_i32_1 = arith.constant 0 : i32
    return %c0_i32, %c0_i32_0 : i32, i32
  }
  func.func @transform_4(%arg0: i32, %arg1: i32) -> (i32, i32) {
    %c0_i32 = arith.constant 0 : i32
    %c0_i32_0 = arith.constant 0 : i32
    %c0_i32_1 = arith.constant 0 : i32
    return %c0_i32, %c0_i32_0 : i32, i32
  }
  func.func @transform_5(%arg0: i32, %arg1: i32) -> (i32, i32) {
    %c0_i32 = arith.constant 0 : i32
    %c0_i32_0 = arith.constant 0 : i32
    %c0_i32_1 = arith.constant 0 : i32
    return %c0_i32, %c0_i32_0 : i32, i32
  }
  func.func @transform_6(%arg0: i32, %arg1: i32) -> (i32, i32) {
    %c0_i32 = arith.constant 0 : i32
    %c0_i32_0 = arith.constant 0 : i32
    %c0_i32_1 = arith.constant 0 : i32
    return %c0_i32, %c0_i32_0 : i32, i32
  }
  func.func @transform_7(%arg0: i32, %arg1: i32) -> (i32, i32, i32) {
    %c0_i32 = arith.constant 0 : i32
    %c0_i32_0 = arith.constant 0 : i32
    return %arg0, %arg1, %c0_i32 : i32, i32, i32
  }
}

</mosaic_0001>

<bundles_post_ra>
// kernel: mha_ane_forward.2
= control target key start
LH: loop header
LB: loop body
LE: loop exit
PB: predicated region body
PF: predicated region fallthrough
CT: control target
= control target key end

     0   :  { %s847_s21 = smov 0   ;;  %s849_s22 = smov 0   ;;  %s908_s0 = inlined_call_operand.vmem [shape: bf16[2,32,16], index: 0, kind: input, shape index: {}]   ;;  %s909_s1 = inlined_call_operand.vmem [shape: bf16[2,16,32], index: 1, kind: input, shape index: {}]   ;;  %s910_s2 = inlined_call_operand.vmem [shape: bf16[32,32], index: 2, kind: input, shape index: {}]   ;;  %s911_s3 = inlined_call_operand.vmem [shape: bf16[32,32], index: 3, kind: input, shape index: {}]   ;;  %s912_s4 = inlined_call_operand.vmem [shape: f32[1,32], index: 4, kind: input, shape index: {}]   ;;  %s913_s5 = inlined_call_operand.vmem [shape: bf16[2,32,16], index: 5, kind: output, shape index: {0}]   ;;  %s914_s6 = inlined_call_operand.vmem [shape: bf16[2,16,32], index: 6, kind: output, shape index: {1}]  }
   0x1   :  { %s851_s23 = smov 0  }
   0x2 LB: > { %s29_s24 = sadd.s32 1, %s804_s22  ;;  %p692_p0 = scmp.ge.s32.totalorder %s808_s23, 1  ;;  %s808_s23 = sphi %s851_s23, %s17_s23   ;;  %s804_s22 = sphi %s849_s22, %s916_s22   ;;  %s800_s21 = sphi %s847_s21, %s915_s21  }
   0x3   : > { %p31_p1 = scmp.ge.s32.totalorder %s29_s24, 2  ;;  %p253_p2 = scmp.lt.s32.totalorder %s808_s23, 3 }
   0x5   : > { %s918_s24 = smov (%p31_p1, %s29_s24), 0  ;;  %p254_p3 = pnand %p692_p0, %p253_p2 }
   0x6   : > { %p307_p4 = scmp.lt.s32.totalorder (!%p254_p3), %s800_s21, 1 }
   0x7   : > { %257 = sbr.rel (%p254_p3) target bundleno = 226 (0xe2), region = 40 }
   0xc   : > { %v779_v0 = vld [vmem:[%s911_s3 + $0x8] sm:$0xff]   ;;  %v810_v1 = vmov 0.0   ;;  %v780_v2 = vld [vmem:[%s911_s3] sm:$0xff]   ;;  %s920_s21 = smov (!%p307_p4, %s800_s21), 1  ;;  %vm811_vm0 = vmmov 0   ;;  %vm374_vm1 = vcmask 261120  }
   0xd   : > { %745 = vmatprep.subr.bf16.mxu1 %v810_v1  ;;  %749 = vmatprep.mubr.msk.bf16.mxu1 %vm811_vm0, %v810_v1  ;;  %v784_v3 = vld [vmem:[%s910_s2] sm:$0xff]   ;;  %s720_s7 = sshll.u32 %s920_s21, 4  ;;  %s721_s8 = sshll.u32 %s920_s21, 3  ;;  %v785_v7 = vld [vmem:[%s910_s2 + $0x8] sm:$0xff]   ;;  %vm533_vm2 = vcmask 257024   ;;  %vm446_vm3 = vcmask 125952  }
   0xe   : > { %746 = vmatpush3.bf16.msra.mxu1 %v779_v0  ;;  %741 = vmatprep.mubr.msk.bf16.mxu0 %vm374_vm1, %v784_v3  ;;  %s314_s11 = scalar_lea.vmem %s908_s0, %s720_s7  ;;  %s323_s14 = scalar_lea.vmem %s909_s1, %s721_s8  ;;  %v711_v8 = vld [vmem:[%s912_s4] ss:$0 sm:$0xff] }
   0xf   : > { %747 = vmatprep.subr.bf16.mxu1 %v810_v1  ;;  %v781_v4 = vld [vmem:[%s314_s11 + $0x8] sm:$0xff]   ;;  %v782_v5 = vld [vmem:[%s323_s14] sm:$0xff]   ;;  %s341_s21 = scalar_lea.vmem %s914_s6, %s721_s8  ;;  %s332_s27 = scalar_lea.vmem %s913_s5, %s720_s7 }
  0x10   : > { %737 = vmatprep.subr.bf16.mxu0 %v781_v4  ;;  %v783_v6 = vld [vmem:[%s314_s11] sm:$0xff]  }
  0x11   : > { %738 = vmatpush3.bf16.msra.mxu0 %v781_v4 }
  0x12   : > { %748 = vmatpush3.bf16.msra.mxu1 %v780_v2  ;;  %739 = vmatprep.subr.bf16.mxu0 %v783_v6 }
  0x15   : > { %750 = vmatmul.mubr.msk.bf16.vlgmr.msra.gmra.mxu1 %vm374_vm1, %v782_v5  ;;  %740 = vmatpush3.bf16.msra.mxu0 %v783_v6 }
  0x18   : > { %742 = vmatmul.mubr.msk.bf16.vlgmr.msra.gmra.mxu0 %vm374_vm1, %v785_v7 }
  0xd5   : > { %v518_v9 = vpop.f32.mrf.mxu1 }
  0xd6   : > { %v519_v10 = vadd.f32 %v711_v8, %v518_v9 }
  0xd7   : > { %v751_v11 = vpop.f32.mrf.mxu1 }
  0xd8   : > { %v728_v12 = vpack.c.bf16 %v519_v10, %v519_v10  ;;  %v743_v17 = vpop.f32.mrf.mxu0 }
  0xd9   : > { %v521_v13 = vpop.f32.mrf.mxu1  ;;  %v726_v18 = vpack.c.bf16 %v743_v17, %v743_v17 }
  0xda   : > { %534 = vst.msk [vmem:[%s341_s21] sm:$0xf] %vm533_vm2, %v728_v12  ;;  %v522_v14 = vadd.f32 %v711_v8, %v521_v13  ;;  %v415_v19 = vpop.f32.mrf.mxu0 }
  0xdb   : > { %v752_v15 = vpop.f32.mrf.mxu1  ;;  %449 = vst.msk [vmem:[%s332_s27 + $0x8] sm:$0xf] %vm446_vm3, %v726_v18  ;;  %v724_v20 = vpack.c.bf16 %v415_v19, %v415_v19 }
  0xdc   : > { %v729_v16 = vpack.c.bf16 %v522_v14, %v522_v14  ;;  %v744_v21 = vpop.f32.mrf.mxu0 }
  0xdd   : > { %447 = vst.msk [vmem:[%s332_s27] sm:$0xf] %vm446_vm3, %v724_v20  ;;  %v727_v22 = vpack.c.bf16 %v744_v21, %v744_v21 }
  0xde   : > { %535 = vst.msk [vmem:[%s341_s21 + $0x4] sm:$0xf] %vm533_vm2, %v729_v16  ;;  %v418_v23 = vpop.f32.mrf.mxu0 }
  0xdf   : > { %450 = vst.msk [vmem:[%s332_s27 + $0xc] sm:$0xf] %vm446_vm3, %v727_v22  ;;  %v725_v24 = vpack.c.bf16 %v418_v23, %v418_v23 }
  0xe1   : > { %448 = vst.msk [vmem:[%s332_s27 + $0x4] sm:$0xf] %vm446_vm3, %v725_v24 }
  0xe2 PF: > { %s17_s23 = sadd.s32 1, %s808_s23   ;;  %s915_s21 = smov %s804_s22 }
  0xe3   : > { %p14_p5 = scmp.ge.s32.totalorder %s17_s23, 4   ;;  %s916_s22 = smov %s918_s24 }
  0xe5   :  { %16 = sbr.rel (!%p14_p5) target bundleno = 2 (0x2), region = 85 }

// kernel: mha_ane_forward.3
= control target key start
LH: loop header
LB: loop body
LE: loop exit
PB: predicated region body
PF: predicated region fallthrough
CT: control target
= control target key end

     0   :  { %12 = vsyncpa [#allocation5], 0  ;;  %s1845_s0 = inlined_call_operand.vmem [shape: bf16[2,16,32], index: 0, kind: input, shape index: {}]   ;;  %s1846_s1 = inlined_call_operand.vmem [shape: bf16[2,32,16], index: 1, kind: input, shape index: {}]   ;;  %s1847_s2 = inlined_call_operand.vmem [shape: bf16[2,16,32], index: 2, kind: input, shape index: {}]   ;;  %s1848_s3 = inlined_call_operand.vmem [shape: bf16[32,32], index: 3, kind: input, shape index: {}]   ;;  %s1849_s4 = inlined_call_operand.vmem [shape: f32[1,32], index: 4, kind: input, shape index: {}]   ;;  %s1850_s5 = inlined_call_operand.vmem [shape: bf16[32,32], index: 5, kind: input, shape index: {}]   ;;  %s1851_s6 = inlined_call_operand.vmem [shape: f32[1,32], index: 6, kind: input, shape index: {}]   ;;  %s1852_s7 = inlined_call_operand.hbm [shape: f32[2,16,32], index: 7, kind: output, shape index: {}]  }
   0x1   :  { %14 = vsyncpa [#allocation5 + $0x1], 0  ;;  %s1612_s24 = smov 0   ;;  %s1614_s25 = smov 0  }
   0x2   :  { %s1616_s26 = smov 0   ;;  %s1618_s27 = smov 0  }
   0x3   :  { %s1620_s28 = smov 0   ;;  %s1622_s29 = smov 0  }
   0x4 LB: > { %s1221_s30 = sadd.s32 4294967295, %s1560_s29   ;;  %s1222_s8 = sadd.s32 4294967294, %s1560_s29   ;;  %s1560_s29 = sphi %s1622_s29, %s20_s29   ;;  %s1556_s28 = sphi %s1620_s28, %s1859_s28   ;;  %s1552_s27 = sphi %s1618_s27, %s1858_s27   ;;  %s1548_s26 = sphi %s1616_s26, %s1857_s26   ;;  %s1544_s25 = sphi %s1614_s25, %s1856_s25   ;;  %s1540_s24 = sphi %s1612_s24, %s1855_s24  }
   0x5   : > { %s32_s9 = sadd.s32 1, %s1556_s28  ;;  %s205_s10 = sadd.s32 1, %s1548_s26 }
   0x6   : > { %p34_p0 = scmp.ge.s32.totalorder %s32_s9, 2  ;;  %p215_p1 = scmp.ne.s32.totalorder %s1548_s26, %s1544_s25 }
   0x7   : > { %p216_p2 = scmp.eq.s32.totalorder %s1221_s30, 1  ;;  %p221_p3 = scmp.ne.s32.totalorder %s1544_s25, %s1540_s24 }
   0x8   : > { %s1861_s9 = smov (%p34_p0, %s32_s9), 0  ;;  %p222_p5 = scmp.eq.s32.totalorder %s1222_s8, 1 }
   0x9   : > { %p1652_p4 = por %p216_p2, %p215_p1  ;;  %s200_s12 = ssub.s32 %s1556_s28, %s1861_s9 }
   0xa   : > { %p1225_p6 = scmp.ge.s32.totalorder %s1560_s29, 1  ;;  %p203_p7 = scmp.eq.s32.totalorder %s200_s12, 0 }
   0xb   : > { %p1659_p8 = por %p222_p5, %p221_p3  ;;  %p281_p9 = scmp.lt.s32.totalorder %s1560_s29, 3 }
   0xc   : > { %s1665_s14 = scalar_select %p203_p7, %s1548_s26, %s205_s10  }
   0xd   : > { %p282_p10 = pnand %p1225_p6, %p281_p9 }
   0xe   : > { %p328_p11 = scmp.lt.s32.totalorder (!%p282_p10), %s1552_s27, 1  ;;  %s1565_s21 = smov (!%p282_p10), 120  }
   0xf   : > { %285 = sbr.rel (%p282_p10) target bundleno = 1308 (0x51c), region = 48  ;;  %s1566_s22 = smov (!%p282_p10), 112  }
  0x10   : > { %s1568_s30 = smov (!%p282_p10), 16   ;;  %s1569_s16 = smov (!%p282_p10), 24  }
  0x14   : > { %v1438_v0 = vld [vmem:[%s1848_s3 + $0x8] sm:$0xff]   ;;  %v1562_v1 = vmov 0.0   ;;  %v1439_v2 = vld [vmem:[%s1848_s3] sm:$0xff]   ;;  %vm1563_vm0 = vmmov 0   ;;  %s329_s19 = scalar_select %p328_p11, %s1552_s27, 1  ;;  %vm379_vm1 = vcmask 261120  }
  0x15   : > { %1310 = vmatprep.subr.bf16.mxu0 %v1562_v1  ;;  %1318 = vmatprep.subr.bf16.mxu1 %v1562_v1  ;;  %vm447_vm2 = vcmask 1043456   ;;  %v1233_v8 = vld [vmem:[%s1849_s4] ss:$0 sm:$0xff]  ;;  %vm432_vm3 = vcmask 257024   ;;  %vm443_vm4 = vcmask 64512   ;;  %vm492_vm5 = vcmask 130048  }
  0x16   : > { %1311 = vmatpush3.bf16.msra.mxu0 %v1438_v0  ;;  %1314 = vmatprep.mubr.msk.bf16.mxu0 %vm1563_vm0, %v1562_v1  ;;  %s1274_s20 = sshll.u32 %s329_s19, 3  ;;  %s1275_s12 = sshll.u32 %s329_s19, 4  ;;  %vm576_vm6 = vcmask 60416   ;;  %vm725_vm7 = vcmask 126016   ;;  %vm874_vm8 = vcmask 191616   ;;  %vm1023_vm9 = vcmask 257216  }
  0x17   : > { %1312 = vmatprep.subr.bf16.mxu0 %v1562_v1  ;;  %1320 = vmatprep.mubr.msk.bf16.mxu1 %vm1563_vm0, %v1562_v1  ;;  %s335_s23 = scalar_lea.vmem %s1845_s0, %s1274_s20  ;;  %s1689_s10 = scalar_lea.vmem %s1847_s2, %s1274_s20 }
  0x18   : > { %v1440_v3 = vld [vmem:[%s335_s23] sm:$0xff]   ;;  %s1697_s17 = scalar_lea.vmem %s1846_s1, %s1275_s12  ;;  %s1564_s20 = smov 104  }
  0x19   : > { %v437_v4 = vld [vmem:[%s1697_s17] sm:$0xf]  ;;  %v581_v6 = vld [vmem:[%s1697_s17 + $0x4] sm:$0xf]  ;;  %v730_v21 = vld [vmem:[%s1697_s17 + $0x8] sm:$0xf] }
  0x1a   : > { %1313 = vmatpush3.bf16.msra.mxu0 %v1439_v2  ;;  %v449_v5 = vsel %vm447_vm2, %v437_v4, 0  ;;  %v593_v7 = vsel %vm447_vm2, %v581_v6, 0  ;;  %v742_v22 = vsel %vm447_vm2, %v730_v21, 0  ;;  %v879_v24 = vld [vmem:[%s1697_s17 + $0xc] sm:$0xf]  ;;  %v1447_v34 = vld [vmem:[%s1689_s10] sm:$0xff]  }
  0x1b   : > { %1330 = vmatprep.subr.bf16.mxu0 %v1562_v1  ;;  %1319 = vmatpush3.bf16.msra.mxu1 %v449_v5  ;;  %v891_v25 = vsel %vm447_vm2, %v879_v24, 0  ;;  %v1445_v54 = vld [vmem:[%s1689_s10] sm:$0xff]   ;;  %s1567_s23 = smov 8   ;;  %s324_s17 = sand.u32 1, %s1544_s25  }
  0x1c   : > { %1324 = vmatprep.subr.bf16.mxu1 %v1562_v1  ;;  %v1446_v59 = vld [vmem:[%s1689_s10] sm:$0xff]   ;;  %s1226_s18 = sshll.u32 %s324_s17, 4  ;;  %s1799_s15 = scalar_lea.sflag [#allocation5], %s324_s17 }
  0x1d   : > { %1315 = vmatmul.mubr.msk.bf16.vlgmr.msra.gmra.mxu0 %vm379_vm1, %v1440_v3  ;;  %v1448_v0 = vld [vmem:[%s1689_s10] sm:$0xff]  }
  0x1e   : > { %1332 = vmatprep.mubr.msk.bf16.mxu0 %vm1563_vm0, %v1562_v1  ;;  %1331 = vmatpush3.bf16.msra.mxu0 %v593_v7 }
  0x1f   : > { %1342 = vmatprep.subr.bf16.mxu0 %v1562_v1 }
  0xdd   : > { %v417_v9 = vpop.f32.mrf.mxu0 }
  0xde   : > { %v418_v10 = vadd.f32 %v1233_v8, %v417_v9 }
  0xdf   : > { %v1316_v11 = vpop.f32.mrf.mxu0 }
  0xe0   : > { %v1277_v12 = vpack.c.bf16 %v418_v10, %v418_v10 }
  0xe1   : > { %v420_v13 = vpop.f32.mrf.mxu0 }
  0xe2   : > { %433 = vst.msk [vmem:[#allocation2] sm:$0xf] %vm432_vm3, %v1277_v12  ;;  %v421_v14 = vadd.f32 %v1233_v8, %v420_v13 }
  0xe3   : > { %v1317_v15 = vpop.f32.mrf.mxu0 }
  0xe4   : > { %v1278_v16 = vpack.c.bf16 %v421_v14, %v421_v14 }
  0xe6   : > { %434 = vst.msk [vmem:[#allocation2 + $0x4] sm:$0xf] %vm432_vm3, %v1278_v16 }
  0xed   : > { %v1441_v17 = vld [vmem:[#allocation2] sm:$0xff]  }
  0xee   : > { %v1442_v18 = vld [vmem:[#allocation2] sm:$0xff]   ;;  %885 = vrot.lane.b32.xlu1 %v1441_v17, %s1564_s20 }
  0xef   : > { %v1443_v19 = vld [vmem:[#allocation2] sm:$0xff]   ;;  %587 = vrot.lane.b32.xlu0 %v1442_v18, %s1565_s21 }
  0xf0   : > { %1321 = vmatmul.mubr.msk.bf16.vlgmr.msra.gmra.mxu1 %vm443_vm4, %v1443_v19  ;;  %v1444_v20 = vld [vmem:[#allocation2] sm:$0xff]  }
  0xf1   : > { %1326 = vmatprep.mubr.msk.bf16.mxu1 %vm1563_vm0, %v1562_v1  ;;  %1325 = vmatpush3.bf16.msra.mxu1 %v1447_v34 }
  0xf2   : > { %1336 = vmatprep.subr.bf16.mxu1 %v1562_v1 }
  0xf3   : > { %736 = vrot.lane.b32.xlu0 %v1444_v20, %s1566_s22 }
 0x160   : > { %v886_v27 = vpop.permute.xlu1 %885 }
 0x161   : > { %v588_v23 = vpop.permute.xlu0 %587 }
 0x162   : > { %1333 = vmatmul.mubr.msk.bf16.vlgmr.msra.gmra.mxu0 %vm443_vm4, %v588_v23 }
 0x163   : > { %1343 = vmatpush3.bf16.msra.mxu0 %v742_v22  ;;  %1344 = vmatprep.mubr.msk.bf16.mxu0 %vm1563_vm0, %v1562_v1 }
 0x164   : > { %1354 = vmatprep.subr.bf16.mxu0 %v1562_v1 }
 0x165   : > { %v737_v26 = vpop.permute.xlu0 %736 }
 0x16a   : > { %1345 = vmatmul.mubr.msk.bf16.vlgmr.msra.gmra.mxu0 %vm443_vm4, %v737_v26 }
 0x16b   : > { %1355 = vmatpush3.bf16.msra.mxu0 %v891_v25  ;;  %1356 = vmatprep.mubr.msk.bf16.mxu0 %vm1563_vm0, %v1562_v1 }
 0x16c   : > { %1366 = vmatprep.subr.bf16.mxu0 %v1562_v1 }
 0x172   : > { %1357 = vmatmul.mubr.msk.bf16.vlgmr.msra.gmra.mxu0 %vm443_vm4, %v886_v27 }
 0x173   : > { %1370 = vmatprep.mubr.msk.bf16.mxu0 %vm1563_vm0, %v1562_v1 }
 0x1b0   : > { %v485_v28 = vpop.f32.mrf.mxu1 }
 0x1b1   : > { %v493_v29 = vsel %vm492_vm5, %v485_v28, -inf }
 0x1b2   : > { %494 = vmax.xlane.f32.xlu1 %v493_v29  ;;  %v1322_v30 = vpop.f32.mrf.mxu1 }
 0x1b4   : > { %v488_v31 = vpop.f32.mrf.mxu1 }
 0x1b5   : > { %v496_v32 = vsel %vm492_vm5, %v488_v31, -inf }
 0x1b6   : > { %497 = vmax.xlane.f32.xlu0 %v496_v32  ;;  %v1323_v33 = vpop.f32.mrf.mxu1 }
 0x222   : > { %v629_v35 = vpop.f32.mrf.mxu0 }
 0x223   : > { %v636_v36 = vsel %vm492_vm5, %v629_v35, -inf }
 0x224   : > { %637 = vmax.xlane.f32.xlu0 %v636_v36  ;;  %v1334_v37 = vpop.f32.mrf.mxu0 }
 0x226   : > { %v632_v38 = vpop.f32.mrf.mxu0 }
 0x227   : > { %v639_v39 = vsel %vm492_vm5, %v632_v38, -inf }
 0x228   : > { %640 = vmax.xlane.f32.xlu1 %v639_v39  ;;  %v1335_v40 = vpop.f32.mrf.mxu0 }
 0x22a   : > { %v778_v41 = vpop.f32.mrf.mxu0 }
 0x22b   : > { %v785_v42 = vsel %vm492_vm5, %v778_v41, -inf }
 0x22c   : > { %786 = vmax.xlane.f32.xlu0 %v785_v42  ;;  %v1346_v43 = vpop.f32.mrf.mxu0 }
 0x22e   : > { %v781_v44 = vpop.f32.mrf.mxu0 }
 0x22f   : > { %v788_v45 = vsel %vm492_vm5, %v781_v44, -inf }
 0x230   : > { %789 = vmax.xlane.f32.xlu1 %v788_v45  ;;  %v1347_v46 = vpop.f32.mrf.mxu0 }
 0x232   : > { %v927_v47 = vpop.f32.mrf.mxu0 }
 0x233   : > { %v934_v48 = vsel %vm492_vm5, %v927_v47, -inf }
 0x234   : > { %935 = vmax.xlane.f32.xlu0 %v934_v48  ;;  %v1358_v49 = vpop.f32.mrf.mxu0 }
 0x236   : > { %v1738_v50 = vpop.f32.mrf.mxu0 }
 0x237   : > { %v937_v63 = vsel %vm492_vm5, %v1738_v50, -inf }
 0x238   : > { %v1359_v51 = vpop.f32.mrf.mxu0 }
 0x23b   : > { %v495_v52 = vpop.xlane.xlu1 %494 }
 0x23c   : > { %v499_v53 = vsub.f32 %v485_v28, %v495_v52 }
 0x23e   : > { %v501_v55 = vmul.f32 1.442695, %v499_v53 }
 0x23f   : > { %v498_v56 = vpop.xlane.xlu0 %497 }
 0x240   : > { %v500_v57 = vsub.f32 %v488_v31, %v498_v56  ;;  %1452 = vpow2.f32 %v501_v55 }
 0x241   : > { %811 = vrot.lane.b32.xlu1 %v1445_v54, %s1566_s22 }
 0x242   : > { %v503_v58 = vmul.f32 1.442695, %v500_v57 }
 0x244   : > { %1454 = vpow2.f32 %v503_v58 }
 0x24a   : > { %662 = vrot.lane.b32.xlu0 %v1446_v59, %s1565_s21  ;;  %s326_s21 = scalar_lea.vmem [#allocation4], %s1226_s18 }
 0x24b   : > { %s1118_s22 = sshll.u32 %s326_s21, 4  ;;  %s1791_s22 = int_to_ptr.vmem [resolvable:$true] %s1118_s22 }
 0x24d   : > { %v1453_v60 = vpop.eup %1452 }
 0x24e   : > { %v505_v31 = vsel %vm492_vm5, %v1453_v60, 0.0 }
 0x251   : > { %v1744_v61 = vpop.eup %1454 }
 0x252   : > { %v513_v62 = vpack.c.bf16 %v1744_v61, %v1453_v60  ;;  %v508_v39 = vsel %vm492_vm5, %v1744_v61, 0.0 }
 0x254   : > { %1327 = vmatmul.mubr.msk.bf16.vlgmr.msra.gmra.mxu1 %vm492_vm5, %v513_v62 }
 0x255   : > { %1338 = vmatprep.mubr.msk.bf16.mxu1 %vm1563_vm0, %v1562_v1 }
 0x265   : > { %938 = vmax.xlane.f32.xlu1 %v937_v63 }
 0x276   : > { %960 = vrot.lane.b32.xlu1 %v1448_v0, %s1564_s20 }
 0x2ad   : > { %v638_v2 = vpop.xlane.xlu0 %637 }
 0x2ae   : > { %v642_v3 = vsub.f32 %v629_v35, %v638_v2 }
 0x2b0   : > { %v644_v4 = vmul.f32 1.442695, %v642_v3 }
 0x2b1   : > { %v641_v5 = vpop.xlane.xlu1 %640 }
 0x2b2   : > { %1456 = vpow2.f32 %v644_v4  ;;  %v643_v6 = vsub.f32 %v632_v38, %v641_v5 }
 0x2b4   : > { %v646_v7 = vmul.f32 1.442695, %v643_v6 }
 0x2b5   : > { %v787_v8 = vpop.xlane.xlu0 %786 }
 0x2b6   : > { %1458 = vpow2.f32 %v646_v7  ;;  %v791_v9 = vsub.f32 %v778_v41, %v787_v8 }
 0x2b8   : > { %v793_v10 = vmul.f32 1.442695, %v791_v9 }
 0x2b9   : > { %v790_v11 = vpop.xlane.xlu1 %789 }
 0x2ba   : > { %1460 = vpow2.f32 %v793_v10  ;;  %v792_v12 = vsub.f32 %v781_v44, %v790_v11 }
 0x2bc   : > { %v795_v13 = vmul.f32 1.442695, %v792_v12 }
 0x2bd   : > { %v936_v14 = vpop.xlane.xlu0 %935  ;;  %v812_v23 = vpop.permute.xlu1 %811 }
 0x2be   : > { %1462 = vpow2.f32 %v795_v13  ;;  %v940_v15 = vsub.f32 %v927_v47, %v936_v14 }
 0x2bf   : > { %v1457_v16 = vpop.eup %1456 }
 0x2c0   : > { %v942_v17 = vmul.f32 1.442695, %v940_v15  ;;  %v648_v18 = vsel %vm492_vm5, %v1457_v16, 0.0  ;;  %v1449_v15 = vld [vmem:[%s1850_s5 + $0x8] sm:$0xff]  }
 0x2c1   : > { %649 = vadd.xlane.f32.xlu0 %v648_v18  ;;  %v663_v19 = vpop.permute.xlu0 %662  ;;  %1367 = vmatpush3.bf16.msra.mxu0 %v1449_v15 }
 0x2c2   : > { %1464 = vpow2.f32 %v942_v17  ;;  %1337 = vmatpush3.bf16.msra.mxu1 %v663_v19  ;;  %1368 = vmatprep.subr.bf16.mxu0 %v1562_v1 }
 0x2c3   : > { %v1459_v20 = vpop.eup %1458  ;;  %1348 = vmatprep.subr.bf16.mxu1 %v1562_v1 }
 0x2c4   : > { %v651_v21 = vsel %vm492_vm5, %v1459_v20, 0.0  ;;  %v656_v22 = vpack.c.bf16 %v1459_v20, %v1457_v16  ;;  %v1450_v16 = vld [vmem:[%s1850_s5] sm:$0xff]  }
 0x2c5   : > { %652 = vadd.xlane.f32.xlu1 %v651_v21  ;;  %1369 = vmatpush3.bf16.msra.mxu0 %v1450_v16 }
 0x2c6   : > { %1339 = vmatmul.mubr.msk.bf16.vlgmr.msra.gmra.mxu1 %vm492_vm5, %v656_v22 }
 0x2c7   : > { %v1461_v24 = vpop.eup %1460  ;;  %1349 = vmatpush3.bf16.msra.mxu1 %v812_v23  ;;  %1350 = vmatprep.mubr.msk.bf16.mxu1 %vm1563_vm0, %v1562_v1 }
 0x2c8   : > { %v797_v25 = vsel %vm492_vm5, %v1461_v24, 0.0  ;;  %1360 = vmatprep.subr.bf16.mxu1 %v1562_v1 }
 0x2c9   : > { %798 = vadd.xlane.f32.xlu0 %v797_v25 }
 0x2cb   : > { %v1463_v26 = vpop.eup %1462 }
 0x2cc   : > { %v800_v27 = vsel %vm492_vm5, %v1463_v26, 0.0  ;;  %v805_v28 = vpack.c.bf16 %v1463_v26, %v1461_v24 }
 0x2cd   : > { %801 = vadd.xlane.f32.xlu0 %v800_v27 }
 0x2ce   : > { %1351 = vmatmul.mubr.msk.bf16.vlgmr.msra.gmra.mxu1 %vm492_vm5, %v805_v28 }
 0x2cf   : > { %v1465_v29 = vpop.eup %1464  ;;  %1362 = vmatprep.mubr.msk.bf16.mxu1 %vm1563_vm0, %v1562_v1 }
 0x2d0   : > { %v946_v30 = vsel %vm492_vm5, %v1465_v29, 0.0 }
 0x2d1   : > { %947 = vadd.xlane.f32.xlu1 %v946_v30 }
 0x2d5   : > { %506 = vadd.xlane.f32.xlu1 %v505_v31 }
 0x2ee   : > { %v939_v32 = vpop.xlane.xlu1 %938 }
 0x2ef   : > { %v941_v33 = vsub.f32 %v1738_v50, %v939_v32 }
 0x2f1   : > { %v944_v34 = vmul.f32 1.442695, %v941_v33  ;;  %v1264_v33 = vld [vmem:[%s1851_s6] ss:$0 sm:$0xff] }
 0x2f2   : > { %v961_v35 = vpop.permute.xlu1 %960 }
 0x2f3   : > { %1466 = vpow2.f32 %v944_v34  ;;  %1361 = vmatpush3.bf16.msra.mxu1 %v961_v35 }
 0x300   : > { %v1467_v36 = vpop.eup %1466 }
 0x301   : > { %v949_v37 = vsel %vm492_vm5, %v1467_v36, 0.0  ;;  %v954_v38 = vpack.c.bf16 %v1467_v36, %v1465_v29 }
 0x302   : > { %950 = vadd.xlane.f32.xlu0 %v949_v37 }
 0x303   : > { %1363 = vmatmul.mubr.msk.bf16.vlgmr.msra.gmra.mxu1 %vm492_vm5, %v954_v38 }
 0x306   : > { %509 = vadd.xlane.f32.xlu0 %v508_v39 }
 0x314   : > { %v557_v40 = vpop.f32.mrf.mxu1 }
 0x316   : > { %v1328_v41 = vpop.f32.mrf.mxu1 }
 0x318   : > { %v560_v42 = vpop.f32.mrf.mxu1 }
 0x31a   : > { %v1329_v43 = vpop.f32.mrf.mxu1 }
 0x34a   : > { %v650_v50 = vpop.xlane.xlu0 %649 }
 0x34e   : > { %v653_v44 = vpop.xlane.xlu1 %652 }
 0x352   : > { %v799_v51 = vpop.xlane.xlu0 %798 }
 0x356   : > { %v802_v52 = vpop.xlane.xlu0 %801 }
 0x35a   : > { %v948_v45 = vpop.xlane.xlu1 %947 }
 0x35e   : > { %v507_v46 = vpop.xlane.xlu1 %506 }
 0x35f   : > { %1468 = vrcp.f32 %v507_v46 }
 0x360   : > { %1470 = vrcp.f32 %v650_v50 }
 0x361   : > { %1472 = vrcp.f32 %v653_v44 }
 0x362   : > { %1474 = vrcp.f32 %v799_v51 }
 0x363   : > { %1476 = vrcp.f32 %v802_v52 }
 0x36c   : > { %v1469_v47 = vpop.eup %1468 }
 0x36d   : > { %v566_v48 = vmul.f32 %v1469_v47, %v557_v40  ;;  %v1471_v53 = vpop.eup %1470 }
 0x36e   : > { %v1473_v58 = vpop.eup %1472 }
 0x36f   : > { %v1279_v49 = vpack.c.bf16 %v566_v48, %v566_v48  ;;  %v1475_v0 = vpop.eup %1474 }
 0x370   : > { %v1477_v7 = vpop.eup %1476 }
 0x371   : > { %577 = vst.msk [vmem:[#allocation3] sm:$0xf] %vm576_vm6, %v1279_v49 }
 0x386   : > { %v702_v54 = vpop.f32.mrf.mxu1 }
 0x387   : > { %v711_v55 = vmul.f32 %v1471_v53, %v702_v54 }
 0x388   : > { %v1340_v56 = vpop.f32.mrf.mxu1 }
 0x389   : > { %v1281_v57 = vpack.c.bf16 %v711_v55, %v711_v55 }
 0x38a   : > { %v705_v59 = vpop.f32.mrf.mxu1 }
 0x38b   : > { %v712_v60 = vmul.f32 %v1473_v58, %v705_v59  ;;  %719 = vrot.lane.b32.xlu1 %v1281_v57, %s1567_s23  ;;  %v951_v61 = vpop.xlane.xlu0 %950 }
 0x38c   : > { %v1341_v62 = vpop.f32.mrf.mxu1 }
 0x38d   : > { %v1282_v63 = vpack.c.bf16 %v712_v60, %v712_v60 }
 0x38e   : > { %v851_v2 = vpop.f32.mrf.mxu1 }
 0x38f   : > { %v860_v3 = vmul.f32 %v1475_v0, %v851_v2  ;;  %v510_v4 = vpop.xlane.xlu0 %509  ;;  %721 = vrot.lane.b32.xlu0 %v1282_v63, %s1567_s23 }
 0x390   : > { %1478 = vrcp.f32 %v510_v4  ;;  %v1352_v5 = vpop.f32.mrf.mxu1 }
 0x391   : > { %v1283_v6 = vpack.c.bf16 %v860_v3, %v860_v3  ;;  %1480 = vrcp.f32 %v948_v45 }
 0x392   : > { %v854_v8 = vpop.f32.mrf.mxu1  ;;  %1482 = vrcp.f32 %v951_v61 }
 0x393   : > { %v861_v9 = vmul.f32 %v1477_v7, %v854_v8  ;;  %868 = vrot.lane.b32.xlu1 %v1283_v6, %s1568_s30 }
 0x394   : > { %v1353_v10 = vpop.f32.mrf.mxu1 }
 0x395   : > { %v1284_v11 = vpack.c.bf16 %v861_v9, %v861_v9 }
 0x397   : > { %870 = vrot.lane.b32.xlu1 %v1284_v11, %s1568_s30  ;;  %s1287_s30 = sshll.u32 %s1552_s27, 8  ;;  %s1484_s27 = scalar_lea.vmem %s1791_s22, 256 }
 0x398   : > { %s1796_s12 = scalar_lea.hbm %s1852_s7, %s1287_s30  ;;  %p1485_p12 = scmp.ne.s32.totalorder %s1791_s22, %s1484_s27 }
 0x39a   : > { %p1486_p13 = pnand %p1485_p12, %p1652_p4 }
 0x39c   : > { %p1487_p0 = pneg %p1486_p13 }
 0x39d   : > { %v1479_v12 = vpop.eup %1478 }
 0x39e   : > { %v567_v13 = vmul.f32 %v1479_v12, %v560_v42  ;;  %v1481_v17 = vpop.eup %1480 }
 0x39f   : > { %v1483_v22 = vpop.eup %1482 }
 0x3a0   : > { %v1280_v14 = vpack.c.bf16 %v567_v13, %v567_v13 }
 0x3a2   : > { %578 = vst.msk [vmem:[#allocation3 + $0x4] sm:$0xf] %vm576_vm6, %v1280_v14 }
 0x3c3   : > { %v1000_v18 = vpop.f32.mrf.mxu1 }
 0x3c4   : > { %v1009_v19 = vmul.f32 %v1481_v17, %v1000_v18 }
 0x3c5   : > { %v1364_v20 = vpop.f32.mrf.mxu1 }
 0x3c6   : > { %v1285_v21 = vpack.c.bf16 %v1009_v19, %v1009_v19 }
 0x3c7   : > { %v1003_v23 = vpop.f32.mrf.mxu1 }
 0x3c8   : > { %v1010_v24 = vmul.f32 %v1483_v22, %v1003_v23  ;;  %1017 = vrot.lane.b32.xlu0 %v1285_v21, %s1569_s16 }
 0x3c9   : > { %v1365_v25 = vpop.f32.mrf.mxu1 }
 0x3ca   : > { %v1286_v26 = vpack.c.bf16 %v1010_v24, %v1010_v24 }
 0x3cc   : > { %1019 = vrot.lane.b32.xlu1 %v1286_v26, %s1569_s16  ;;  %s1570_s16 = smov [#allocation4]  }
 0x3cd   : > { %s1488_s18 = sshll.u32 %s1570_s16, 4  ;;  %s1489_s18 = int_to_ptr.vmem [resolvable:$false] %s1488_s18 }
 0x3ce   : > { %s1490_s19 = scalar_lea.vmem %s1489_s18, 512  ;;  %p1491_p1 = scmp.lt.s32.totalorder %s1791_s22, %s1489_s18 }
 0x3cf   : > { %p1492_p2 = scmp.lt.s32.totalorder %s1490_s19, %s1484_s27 }
 0x3d1   : > { %p1493_p3 = por %p1492_p2, %p1491_p1 }
 0x3d3   : > { %p1494_p5 = pnand %p1493_p3, %p1487_p0 }
 0x3fd   : > { %v720_v27 = vpop.permute.xlu1 %719 }
 0x3fe   : > { %726 = vst.msk [vmem:[#allocation3] sm:$0xf] %vm725_vm7, %v720_v27 }
 0x401   : > { %v722_v28 = vpop.permute.xlu0 %721 }
 0x402   : > { %727 = vst.msk [vmem:[#allocation3 + $0x4] sm:$0xf] %vm725_vm7, %v722_v28 }
 0x405   : > { %v869_v1 = vpop.permute.xlu1 %868 }
 0x406   : > { %875 = vst.msk [vmem:[#allocation3] sm:$0xf] %vm874_vm8, %v869_v1 }
 0x409   : > { %v871_v29 = vpop.permute.xlu1 %870 }
 0x40a   : > { %876 = vst.msk [vmem:[#allocation3 + $0x4] sm:$0xf] %vm874_vm8, %v871_v29 }
 0x43a   : > { %v1018_v30 = vpop.permute.xlu0 %1017 }
 0x43b   : > { %1024 = vst.msk [vmem:[#allocation3] sm:$0xf] %vm1023_vm9, %v1018_v30 }
 0x43e   : > { %v1020_v31 = vpop.permute.xlu1 %1019 }
 0x43f   : > { %1025 = vst.msk [vmem:[#allocation3 + $0x4] sm:$0xf] %vm1023_vm9, %v1020_v31 }
 0x446   : > { %v1451_v32 = vld [vmem:[#allocation3] sm:$0xff]  }
 0x447   : > { %1371 = vmatmul.mubr.msk.bf16.vlgmr.msra.gmra.mxu0 %vm379_vm1, %v1451_v32 }
 0x507   : > { %v1093_v34 = vpop.f32.mrf.mxu0 }
 0x508   : > { %v1094_v35 = vadd.f32 %v1264_v33, %v1093_v34 }
 0x509   : > { %v1372_v36 = vpop.f32.mrf.mxu0 }
 0x50a   : > { %1100 = vst.msk [vmem:[%s326_s21] sm:$0xff] %vm379_vm1, %v1094_v35 }
 0x50b   : > { %v1096_v37 = vpop.f32.mrf.mxu0 }
 0x50c   : > { %v1097_v38 = vadd.f32 %v1264_v33, %v1096_v37 }
 0x50d   : > { %v1373_v39 = vpop.f32.mrf.mxu0 }
 0x50e   : > { %1101 = vst.msk [vmem:[%s326_s21 + $0x8] sm:$0xff] %vm379_vm1, %v1097_v38 }
 0x50f   : > { %1497 = shalt.err (!%p1494_p5)
}
 0x510   : > { %s1498_s17 = scalar_lea.hbm %s1796_s12, 256  ;;  %s1502_s30 = scalar_lea.hbm %s1852_s7, 512 }
 0x511   : > { %p1499_p6 = scmp.ne.s32.totalorder %s1796_s12, %s1498_s17  ;;  %p1503_p10 = scmp.lt.s32.totalorder %s1796_s12, %s1852_s7 }
 0x512   : > { %p1504_p11 = scmp.lt.s32.totalorder %s1502_s30, %s1498_s17 }
 0x513   : > { %p1500_p7 = pnand %p1499_p6, %p1652_p4 }
 0x514   : > { %p1505_p12 = por %p1504_p11, %p1503_p10 }
 0x515   : > { %p1501_p9 = pneg %p1500_p7 }
 0x517   : > { %p1506_p13 = pnand %p1505_p12, %p1501_p9 }
 0x519   : > { %1509 = shalt.err (!%p1506_p13)
}
 0x51a   : > { %s1571_s27 = smov 128  }
 0x51b   : > { %1374 = dma.vmem_to_hbm [thread:$0]  (%p1652_p4), %s1791_s22, 256, %s1796_s12, %s1799_s15, %s1571_s27, %s1571_s27, %s1567_s23  }
 0x51c PF: > { %p1380_p0 = scmp.ge.s32.totalorder %s1560_s29, 2  ;;  %s1133_s16 = sand.u32 1, %s1540_s24  }
 0x51d   : > { %s1134_s18 = scalar_lea.sflag [#allocation5], %s1133_s16 }
 0x51e   : > { %p1377_p1 = pnand %p1380_p0, %p1659_p8 }
 0x520   : > { %p1378_p2 = pneg %p1377_p1 }
 0x522   : > { %1535 = dma.done.wait (%p1378_p2), %s1134_s18, 256  }
 0x523   : > { %1537 = vsyncadd (%p1378_p2), %s1134_s18, 4294967040  ;;  %s20_s29 = sadd.s32 1, %s1560_s29   ;;  %s1855_s24 = smov %s1544_s25 }
 0x524   : > { %p17_p3 = scmp.ge.s32.totalorder %s20_s29, 4   ;;  %s1856_s25 = smov %s1548_s26 }
 0x525   : > { %s1857_s26 = smov %s1665_s14  ;;  %s1858_s27 = smov %s1556_s28 }
 0x526   : > { %s1859_s28 = smov %s1861_s9  ;;  %19 = sbr.rel (!%p17_p3) target bundleno = 4 (0x4), region = 89 }
 0x52b   :  { %1139 = vsyncpa [#allocation5], 1 }
 0x52c   :  { %1141 = vsyncpa [#allocation5 + $0x1], 1 }

</bundles_post_ra>
